<compile_context>
chip_gen: v6e
topology: v6e:2x2x1
jax: 0.10.0
libtpu: 0.0.40
codegen_flags: <defaults>
</compile_context>

<pallas_src>
import functools

import jax
import jax.numpy as jnp
from jax import lax
from jax.experimental import pallas as pl
from jax.experimental.pallas import tpu as pltpu

EPS = 1e-5
LANE = 128
SUBLANE = 8
VMEM_LIMIT = 48 * 1024 * 1024     # safe on v5e/v6e (128 MiB) and v7x (64 MiB); tiles are small


def _round_up(x, m):
    return (x + m - 1) // m * m


# --------------------------------------------------------------------------- kernels
def _conv_stats_kernel(x_ref, w_ref, y_ref, stat_ref):
    """Row tile: 3x3/stride-2 conv as one deep-K matmul over im2col rows (K=9*cin)
    + BN1 partial sum/sumsq taken from the f32 accumulator before the downcast."""
    acc = jnp.dot(x_ref[...], w_ref[...], preferred_element_type=jnp.float32)
    y_ref[...] = acc.astype(y_ref.dtype)
    stat_ref[0, 0:1, :] = jnp.sum(acc, axis=0, keepdims=True)
    stat_ref[0, 1:2, :] = jnp.sum(acc * acc, axis=0, keepdims=True)


def _bn_relu_conv_stats_kernel(y_ref, aff_ref, w_ref, z_ref, stat_ref):
    """Row tile: BN1 apply (folded scale/shift) + ReLU + 1x1 conv + BN2 partials."""
    h = jnp.maximum(y_ref[...].astype(jnp.float32) * aff_ref[0:1, :]
                    + aff_ref[1:2, :], 0.0)
    acc = jnp.dot(h.astype(w_ref.dtype), w_ref[...],
                  preferred_element_type=jnp.float32)
    z_ref[...] = acc.astype(z_ref.dtype)
    stat_ref[0, 0:1, :] = jnp.sum(acc, axis=0, keepdims=True)
    stat_ref[0, 1:2, :] = jnp.sum(acc * acc, axis=0, keepdims=True)


def _bn_relu_nchw_kernel(z_ref, aff_ref, o_ref, *, oc):
    """Per-image row tile: BN2 apply + ReLU, transpose to channel-major in-kernel
    and write only the real oc channels (lane-dense over the spatial dim)."""
    v = jnp.maximum(z_ref[0, :, :].astype(jnp.float32) * aff_ref[0:1, :]
                    + aff_ref[1:2, :], 0.0)
    o_ref[0, :, :] = jnp.transpose(v)[:oc, :]


def _bn_relu_kernel(z_ref, aff_ref, o_ref):
    """Fallback row tile (sublane-unfriendly hw): BN2 apply + ReLU only."""
    o_ref[...] = jnp.maximum(z_ref[...].astype(jnp.float32) * aff_ref[0:1, :]
                             + aff_ref[1:2, :], 0.0)


# --------------------------------------------------------------------------- helpers
def _pick_rows(m, row_bytes, budget=4 << 20, cap=2048):
    """Largest multiple-of-8 divisor of m that is <= min(cap, budget/row_bytes)."""
    target = min(cap, max(SUBLANE, budget // max(row_bytes, 1)), m)
    t = (target // SUBLANE) * SUBLANE
    while t >= SUBLANE:
        if m % t == 0:
            return t
        t -= SUBLANE
    return m


def _pick_hw_tile(hw, cap=2048):
    """Rows-per-image tile for pass 3: full hw, or a multiple-of-128 divisor of hw."""
    if hw <= cap:
        return hw
    t = (cap // LANE) * LANE
    while t >= LANE:
        if hw % t == 0:
            return t
        t -= LANE
    return hw


# --------------------------------------------------------------------------- wrapper
@functools.partial(jax.jit, static_argnames=("compute_dtype",))
def conv_block_wo_maxpooling(x_nchw, w3x3, b3x3, g1, be1, w1x1, b1x1, g2, be2,
                             *, compute_dtype=jnp.bfloat16):
    n, cin, h, w = x_nchw.shape
    oc = w3x3.shape[0]
    ho = (h - 1) // 2 + 1            # = floor((h + 2 - 3)/2) + 1
    wo = (w - 1) // 2 + 1
    hw = ho * wo
    m = n * hw

    k_raw = 9 * cin
    k_p = _round_up(k_raw, SUBLANE)  # full-K blocks, so non-128 last dim stays legal
    oc_p = _round_up(oc, LANE)
    cdt = compute_dtype
    isz = jnp.dtype(cdt).itemsize

    # Conv biases are applied *before* training-mode BatchNorm and are exactly
    # cancelled by the batch-mean subtraction -> dropped from the kernels.
    del b3x3, b1x1

    # ---- wrapper-side tap packing (stride-2 im2col): one deep-K matmul per tile.
    #      x_col[b*hw + i*wo + j, (kh*3+kw)*cin + c] == x_pad1[b, 2i+kh, 2j+kw, c]
    # TODO(synk): for very large cin, build this slab per-tile in VMEM from a
    # parity-decomposed input instead, to avoid the ~2.25x HBM blowup of im2col.
    x_nhwc = jnp.transpose(x_nchw, (0, 2, 3, 1))
    x_pad = jnp.pad(x_nhwc, ((0, 0), (1, 2 * ho - h), (1, 2 * wo - w), (0, 0)))
    taps = [lax.slice(x_pad, (0, kh, kw, 0),
                      (n, kh + 2 * ho - 1, kw + 2 * wo - 1, cin), (1, 2, 2, 1))
            for kh in range(3) for kw in range(3)]
    x_col = jnp.concatenate(taps, axis=-1)                        # (n, ho, wo, 9*cin)
    x_col = jnp.pad(x_col, ((0, 0), (0, 0), (0, 0), (0, k_p - k_raw)))
    x_col = x_col.reshape(m, k_p).astype(cdt)

    # ---- weights: (oc,cin,3,3) -> (9*cin, oc) matching tap order; 1x1 -> (oc, oc)
    w1 = jnp.transpose(w3x3, (2, 3, 1, 0)).reshape(k_raw, oc)
    w1 = jnp.pad(w1, ((0, k_p - k_raw), (0, oc_p - oc))).astype(cdt)
    w2 = jnp.transpose(w1x1[:, :, 0, 0], (1, 0))
    w2 = jnp.pad(w2, ((0, oc_p - oc), (0, oc_p - oc))).astype(cdt)

    pad_c = lambda v: jnp.pad(v.astype(jnp.float32), (0, oc_p - oc))
    g1p, be1p, g2p, be2p = pad_c(g1), pad_c(be1), pad_c(g2), pad_c(be2)

    def fold_bn(stat, gamma, beta):
        s = jnp.sum(stat[:, 0, :], axis=0)
        sq = jnp.sum(stat[:, 1, :], axis=0)
        mean = s / m
        # TODO(synk): one-pass E[x^2]-E[x]^2 variance can lose precision when
        # |mean| >> std; a two-pass/Welford variant would track PyTorch tighter.
        var = jnp.maximum(sq / m - mean * mean, 0.0)
        scale = gamma * lax.rsqrt(var + EPS)
        shift = beta - mean * scale
        return jnp.stack([scale, shift], axis=0)                  # (2, oc_p), f32

    # ===== pass 1: conv3x3 (stride 2, pad 1) + BN1 partial statistics ==============
    tm1 = _pick_rows(m, k_p * isz + oc_p * (isz + 4))
    nt1 = m // tm1
    y, stat1 = pl.pallas_call(
        _conv_stats_kernel,
        grid=(nt1,),
        in_specs=[
            pl.BlockSpec((tm1, k_p), lambda i: (i, 0)),
            pl.BlockSpec((k_p, oc_p), lambda i: (0, 0)),          # resident
        ],
        out_specs=[
            pl.BlockSpec((tm1, oc_p), lambda i: (i, 0)),
            pl.BlockSpec((1, 2, oc_p), lambda i: (i, 0, 0)),
        ],
        out_shape=[
            jax.ShapeDtypeStruct((m, oc_p), cdt),
            jax.ShapeDtypeStruct((nt1, 2, oc_p), jnp.float32),
        ],
        compiler_params=pltpu.CompilerParams(
            dimension_semantics=("parallel",), vmem_limit_bytes=VMEM_LIMIT),
    )(x_col, w1)

    aff1 = fold_bn(stat1, g1p, be1p)

    # ===== pass 2: BN1 apply + ReLU + conv1x1 + BN2 partial statistics =============
    tm2 = _pick_rows(m, oc_p * (2 * isz + 8))
    nt2 = m // tm2
    z, stat2 = pl.pallas_call(
        _bn_relu_conv_stats_kernel,
        grid=(nt2,),
        in_specs=[
            pl.BlockSpec((tm2, oc_p), lambda i: (i, 0)),
            pl.BlockSpec((2, oc_p), lambda i: (0, 0)),            # resident
            pl.BlockSpec((oc_p, oc_p), lambda i: (0, 0)),         # resident
        ],
        out_specs=[
            pl.BlockSpec((tm2, oc_p), lambda i: (i, 0)),
            pl.BlockSpec((1, 2, oc_p), lambda i: (i, 0, 0)),
        ],
        out_shape=[
            jax.ShapeDtypeStruct((m, oc_p), cdt),
            jax.ShapeDtypeStruct((nt2, 2, oc_p), jnp.float32),
        ],
        compiler_params=pltpu.CompilerParams(
            dimension_semantics=("parallel",), vmem_limit_bytes=VMEM_LIMIT),
    )(y, aff1, w2)

    aff2 = fold_bn(stat2, g2p, be2p)

    # ===== pass 3: BN2 apply + ReLU + fused NHWC->NCHW (real channels only) ========
    tr = _pick_hw_tile(hw)
    if tr % SUBLANE == 0:
        nr = hw // tr
        out = pl.pallas_call(
            functools.partial(_bn_relu_nchw_kernel, oc=oc),
            grid=(n, nr),
            in_specs=[
                pl.BlockSpec((1, tr, oc_p), lambda b, r: (b, r, 0)),
                pl.BlockSpec((2, oc_p), lambda b, r: (0, 0)),     # resident
            ],
            out_specs=pl.BlockSpec((1, oc, tr), lambda b, r: (b, 0, r)),
            out_shape=jax.ShapeDtypeStruct((n, oc, hw), jnp.float32),
            compiler_params=pltpu.CompilerParams(
                dimension_semantics=("parallel", "parallel"),
                vmem_limit_bytes=VMEM_LIMIT),
        )(z.reshape(n, hw, oc_p), aff2)
        return out.reshape(n, oc, ho, wo)

    # Fallback for sublane-unfriendly hw: padded-channel write + XLA epilogue.
    out_flat = pl.pallas_call(
        _bn_relu_kernel,
        grid=(nt2,),
        in_specs=[
            pl.BlockSpec((tm2, oc_p), lambda i: (i, 0)),
            pl.BlockSpec((2, oc_p), lambda i: (0, 0)),
        ],
        out_specs=pl.BlockSpec((tm2, oc_p), lambda i: (i, 0)),
        out_shape=jax.ShapeDtypeStruct((m, oc_p), jnp.float32),
        compiler_params=pltpu.CompilerParams(
            dimension_semantics=("parallel",), vmem_limit_bytes=VMEM_LIMIT),
    )(z, aff2)
    out = out_flat.reshape(n, ho, wo, oc_p)[:, :, :, :oc]
    return jnp.transpose(out, (0, 3, 1, 2))


# --------------------------------------------------------------------------- reference
def _reference(x, w3x3, b3x3, g1, be1, w1x1, b1x1, g2, be2):
    """Pure-JAX reference mirroring the PyTorch forward (training-mode BN)."""
    dn = ("NCHW", "OIHW", "NCHW")

    def bn_relu(y, g, b):
        mean = jnp.mean(y, axis=(0, 2, 3), keepdims=True)
        var = jnp.mean((y - mean) ** 2, axis=(0, 2, 3), keepdims=True)
        y = (y - mean) * lax.rsqrt(var + EPS)
        y = y * g.reshape(1, -1, 1, 1) + b.reshape(1, -1, 1, 1)
        return jnp.maximum(y, 0.0)

    y = lax.conv_general_dilated(x, w3x3, (2, 2), [(1, 1), (1, 1)],
                                 dimension_numbers=dn) + b3x3.reshape(1, -1, 1, 1)
    y = bn_relu(y, g1, be1)
    z = lax.conv_general_dilated(y, w1x1, (1, 1), [(0, 0), (0, 0)],
                                 dimension_numbers=dn) + b1x1.reshape(1, -1, 1, 1)
    return bn_relu(z, g2, be2)


if __name__ == "__main__":
    key = jax.random.PRNGKey(0)
    in_c, out_c = 4, 8
    n, h, w = 2, 16, 16

    ks = jax.random.split(key, 9)
    x = jax.random.normal(ks[0], (n, in_c, h, w), jnp.float32)
    w3x3 = jax.random.normal(ks[1], (out_c, in_c, 3, 3), jnp.float32) * 0.2
    b3x3 = jax.random.normal(ks[2], (out_c,), jnp.float32) * 0.1
    g1 = 1.0 + 0.1 * jax.random.normal(ks[3], (out_c,), jnp.float32)
    be1 = 0.1 * jax.random.normal(ks[4], (out_c,), jnp.float32)
    w1x1 = jax.random.normal(ks[5], (out_c, out_c, 1, 1), jnp.float32) * 0.2
    b1x1 = jax.random.normal(ks[6], (out_c,), jnp.float32) * 0.1
    g2 = 1.0 + 0.1 * jax.random.normal(ks[7], (out_c,), jnp.float32)
    be2 = 0.1 * jax.random.normal(ks[8], (out_c,), jnp.float32)

    args = (x, w3x3, b3x3, g1, be1, w1x1, b1x1, g2, be2)
    ref = _reference(*args)

    # numerically tight structural check (f32 path)
    out32 = jax.block_until_ready(
        conv_block_wo_maxpooling(*args, compute_dtype=jnp.float32))
    assert out32.shape == (n, out_c, h // 2, w // 2), out32.shape
    err32 = float(jnp.max(jnp.abs(out32 - ref)))
    assert err32 < 1e-3, err32

    # default performance path: bf16 intermediates / MXU inputs, f32 stats & output
    out16 = jax.block_until_ready(conv_block_wo_maxpooling(*args))
    assert out16.shape == (n, out_c, h // 2, w // 2), out16.shape
    err16 = float(jnp.max(jnp.abs(out16 - ref)))
    assert err16 < 1e-1, err16

    print("KERNEL_OK")
</pallas_src>

<mosaic_0001>
module attributes {stable_mosaic.version = 11 : i64} {
  func.func @_conv_stats_kernel(%arg0: i32, %arg1: memref<128x40xf32, #tpu.memory_space<vmem>>, %arg2: memref<40x128xf32, #tpu.memory_space<vmem>>, %arg3: memref<128x128xf32, #tpu.memory_space<vmem>>, %arg4: memref<1x2x128xf32, #tpu.memory_space<vmem>>) attributes {dimension_semantics = [#tpu.dimension_semantics<parallel>], iteration_bounds = array<i64: 1>, scalar_prefetch = 0 : i64, scratch_operands = 0 : i64, tpu.core_type = #tpu.core_type<tc>, window_params = [{transform_indices = @transform_0, window_bounds = array<i64: 128, 40>}, {pipeline_mode = #tpu.pipeline_mode<synchronous>, transform_indices = @transform_1, window_bounds = array<i64: 40, 128>}, {transform_indices = @transform_2, window_bounds = array<i64: 128, 128>}, {transform_indices = @transform_3, window_bounds = array<i64: 1, 2, 128>}]} {
    %c0 = arith.constant 0 : index
    %c0_0 = arith.constant 0 : index
    %0 = vector.load %arg1[%c0, %c0_0] : memref<128x40xf32, #tpu.memory_space<vmem>>, vector<128x40xf32>
    %c0_1 = arith.constant 0 : index
    %c0_2 = arith.constant 0 : index
    %1 = vector.load %arg2[%c0_1, %c0_2] : memref<40x128xf32, #tpu.memory_space<vmem>>, vector<40x128xf32>
    %cst = arith.constant dense<0.000000e+00> : vector<128x128xf32>
    %2 = tpu.matmul %0, %1, %cst {dimension_numbers = #tpu.dot_dimension_numbers<[1], [0], [0], [1], [0, 0, 1, 1], [], []>} : vector<128x40xf32>, vector<40x128xf32>, vector<128x128xf32> -> vector<128x128xf32>
    %c0_3 = arith.constant 0 : index
    %c0_4 = arith.constant 0 : index
    %3 = vector.load %arg3[%c0_3, %c0_4] : memref<128x128xf32, #tpu.memory_space<vmem>>, vector<128x128xf32>
    tpu.vector_store %arg3[%c0_3, %c0_4], %2 {strides = array<i32>} : memref<128x128xf32, #tpu.memory_space<vmem>>, vector<128x128xf32>,
    %cst_5 = arith.constant dense<0.000000e+00> : vector<128xf32>
    %4 = vector.multi_reduction <add>, %2, %cst_5 [0] : vector<128x128xf32> to vector<128xf32>
    %5 = vector.shape_cast %4 : vector<128xf32> to vector<1x128xf32>
    %c0_6 = arith.constant 0 : index
    %c0_7 = arith.constant 0 : index
    %c0_8 = arith.constant 0 : index
    %6 = vector.load %arg4[%c0_6, %c0_7, %c0_8] : memref<1x2x128xf32, #tpu.memory_space<vmem>>, vector<1x1x128xf32>
    %7 = vector.shape_cast %6 : vector<1x1x128xf32> to vector<1x128xf32>
    %8 = vector.shape_cast %5 : vector<1x128xf32> to vector<1x1x128xf32>
    tpu.vector_store %arg4[%c0_6, %c0_7, %c0_8], %8 {strides = array<i32>} : memref<1x2x128xf32, #tpu.memory_space<vmem>>, vector<1x1x128xf32>,
    %9 = arith.mulf %2, %2 : vector<128x128xf32>
    %cst_9 = arith.constant dense<0.000000e+00> : vector<128xf32>
    %10 = vector.multi_reduction <add>, %9, %cst_9 [0] : vector<128x128xf32> to vector<128xf32>
    %11 = vector.shape_cast %10 : vector<128xf32> to vector<1x128xf32>
    %c0_10 = arith.constant 0 : index
    %c1 = arith.constant 1 : index
    %c0_11 = arith.constant 0 : index
    %12 = vector.load %arg4[%c0_10, %c1, %c0_11] : memref<1x2x128xf32, #tpu.memory_space<vmem>>, vector<1x1x128xf32>
    %13 = vector.shape_cast %12 : vector<1x1x128xf32> to vector<1x128xf32>
    %14 = vector.shape_cast %11 : vector<1x128xf32> to vector<1x1x128xf32>
    tpu.vector_store %arg4[%c0_10, %c1, %c0_11], %14 {strides = array<i32>} : memref<1x2x128xf32, #tpu.memory_space<vmem>>, vector<1x1x128xf32>,
    return
  }
  func.func @transform_0(%arg0: i32) -> (i32, i32) {
    %c0_i32 = arith.constant 0 : i32
    %c0_i32_0 = arith.constant 0 : i32
    return %arg0, %c0_i32 : i32, i32
  }
  func.func @transform_1(%arg0: i32) -> (i32, i32) {
    %c0_i32 = arith.constant 0 : i32
    %c0_i32_0 = arith.constant 0 : i32
    %c0_i32_1 = arith.constant 0 : i32
    return %c0_i32, %c0_i32_0 : i32, i32
  }
  func.func @transform_2(%arg0: i32) -> (i32, i32) {
    %c0_i32 = arith.constant 0 : i32
    %c0_i32_0 = arith.constant 0 : i32
    return %arg0, %c0_i32 : i32, i32
  }
  func.func @transform_3(%arg0: i32) -> (i32, i32, i32) {
    %c0_i32 = arith.constant 0 : i32
    %c0_i32_0 = arith.constant 0 : i32
    %c0_i32_1 = arith.constant 0 : i32
    return %arg0, %c0_i32, %c0_i32_0 : i32, i32, i32
  }
}

module attributes {stable_mosaic.version = 11 : i64} {
  func.func @_bn_relu_conv_stats_kernel(%arg0: i32, %arg1: memref<128x128xf32, #tpu.memory_space<vmem>>, %arg2: memref<2x128xf32, #tpu.memory_space<vmem>>, %arg3: memref<128x128xf32, #tpu.memory_space<vmem>>, %arg4: memref<128x128xf32, #tpu.memory_space<vmem>>, %arg5: memref<1x2x128xf32, #tpu.memory_space<vmem>>) attributes {dimension_semantics = [#tpu.dimension_semantics<parallel>], iteration_bounds = array<i64: 1>, scalar_prefetch = 0 : i64, scratch_operands = 0 : i64, tpu.core_type = #tpu.core_type<tc>, window_params = [{transform_indices = @transform_0, window_bounds = array<i64: 128, 128>}, {pipeline_mode = #tpu.pipeline_mode<synchronous>, transform_indices = @transform_1, window_bounds = array<i64: 2, 128>}, {pipeline_mode = #tpu.pipeline_mode<synchronous>, transform_indices = @transform_2, window_bounds = array<i64: 128, 128>}, {transform_indices = @transform_3, window_bounds = array<i64: 128, 128>}, {transform_indices = @transform_4, window_bounds = array<i64: 1, 2, 128>}]} {
    %c0 = arith.constant 0 : index
    %c0_0 = arith.constant 0 : index
    %0 = vector.load %arg1[%c0, %c0_0] : memref<128x128xf32, #tpu.memory_space<vmem>>, vector<128x128xf32>
    %c0_1 = arith.constant 0 : index
    %c0_2 = arith.constant 0 : index
    %1 = vector.load %arg2[%c0_1, %c0_2] : memref<2x128xf32, #tpu.memory_space<vmem>>, vector<1x128xf32>
    %2 = vector.broadcast %1 : vector<1x128xf32> to vector<128x128xf32>
    %3 = arith.mulf %0, %2 : vector<128x128xf32>
    %c1 = arith.constant 1 : index
    %c0_3 = arith.constant 0 : index
    %4 = vector.load %arg2[%c1, %c0_3] : memref<2x128xf32, #tpu.memory_space<vmem>>, vector<1x128xf32>
    %5 = vector.broadcast %4 : vector<1x128xf32> to vector<128x128xf32>
    %6 = arith.addf %3, %5 : vector<128x128xf32>
    %cst = arith.constant 0.000000e+00 : f32
    %7 = vector.broadcast %cst : f32 to vector<128x128xf32>
    %8 = arith.maximumf %6, %7 : vector<128x128xf32>
    %c0_4 = arith.constant 0 : index
    %c0_5 = arith.constant 0 : index
    %9 = vector.load %arg3[%c0_4, %c0_5] : memref<128x128xf32, #tpu.memory_space<vmem>>, vector<128x128xf32>
    %cst_6 = arith.constant dense<0.000000e+00> : vector<128x128xf32>
    %10 = tpu.matmul %8, %9, %cst_6 {dimension_numbers = #tpu.dot_dimension_numbers<[1], [0], [0], [1], [0, 0, 1, 1], [], []>} : vector<128x128xf32>, vector<128x128xf32>, vector<128x128xf32> -> vector<128x128xf32>
    %c0_7 = arith.constant 0 : index
    %c0_8 = arith.constant 0 : index
    %11 = vector.load %arg4[%c0_7, %c0_8] : memref<128x128xf32, #tpu.memory_space<vmem>>, vector<128x128xf32>
    tpu.vector_store %arg4[%c0_7, %c0_8], %10 {strides = array<i32>} : memref<128x128xf32, #tpu.memory_space<vmem>>, vector<128x128xf32>,
    %cst_9 = arith.constant dense<0.000000e+00> : vector<128xf32>
    %12 = vector.multi_reduction <add>, %10, %cst_9 [0] : vector<128x128xf32> to vector<128xf32>
    %13 = vector.shape_cast %12 : vector<128xf32> to vector<1x128xf32>
    %c0_10 = arith.constant 0 : index
    %c0_11 = arith.constant 0 : index
    %c0_12 = arith.constant 0 : index
    %14 = vector.load %arg5[%c0_10, %c0_11, %c0_12] : memref<1x2x128xf32, #tpu.memory_space<vmem>>, vector<1x1x128xf32>
    %15 = vector.shape_cast %14 : vector<1x1x128xf32> to vector<1x128xf32>
    %16 = vector.shape_cast %13 : vector<1x128xf32> to vector<1x1x128xf32>
    tpu.vector_store %arg5[%c0_10, %c0_11, %c0_12], %16 {strides = array<i32>} : memref<1x2x128xf32, #tpu.memory_space<vmem>>, vector<1x1x128xf32>,
    %17 = arith.mulf %10, %10 : vector<128x128xf32>
    %cst_13 = arith.constant dense<0.000000e+00> : vector<128xf32>
    %18 = vector.multi_reduction <add>, %17, %cst_13 [0] : vector<128x128xf32> to vector<128xf32>
    %19 = vector.shape_cast %18 : vector<128xf32> to vector<1x128xf32>
    %c0_14 = arith.constant 0 : index
    %c1_15 = arith.constant 1 : index
    %c0_16 = arith.constant 0 : index
    %20 = vector.load %arg5[%c0_14, %c1_15, %c0_16] : memref<1x2x128xf32, #tpu.memory_space<vmem>>, vector<1x1x128xf32>
    %21 = vector.shape_cast %20 : vector<1x1x128xf32> to vector<1x128xf32>
    %22 = vector.shape_cast %19 : vector<1x128xf32> to vector<1x1x128xf32>
    tpu.vector_store %arg5[%c0_14, %c1_15, %c0_16], %22 {strides = array<i32>} : memref<1x2x128xf32, #tpu.memory_space<vmem>>, vector<1x1x128xf32>,
    return
  }
  func.func @transform_0(%arg0: i32) -> (i32, i32) {
    %c0_i32 = arith.constant 0 : i32
    %c0_i32_0 = arith.constant 0 : i32
    return %arg0, %c0_i32 : i32, i32
  }
  func.func @transform_1(%arg0: i32) -> (i32, i32) {
    %c0_i32 = arith.constant 0 : i32
    %c0_i32_0 = arith.constant 0 : i32
    %c0_i32_1 = arith.constant 0 : i32
    return %c0_i32, %c0_i32_0 : i32, i32
  }
  func.func @transform_2(%arg0: i32) -> (i32, i32) {
    %c0_i32 = arith.constant 0 : i32
    %c0_i32_0 = arith.constant 0 : i32
    %c0_i32_1 = arith.constant 0 : i32
    return %c0_i32, %c0_i32_0 : i32, i32
  }
  func.func @transform_3(%arg0: i32) -> (i32, i32) {
    %c0_i32 = arith.constant 0 : i32
    %c0_i32_0 = arith.constant 0 : i32
    return %arg0, %c0_i32 : i32, i32
  }
  func.func @transform_4(%arg0: i32) -> (i32, i32, i32) {
    %c0_i32 = arith.constant 0 : i32
    %c0_i32_0 = arith.constant 0 : i32
    %c0_i32_1 = arith.constant 0 : i32
    return %arg0, %c0_i32, %c0_i32_0 : i32, i32, i32
  }
}

module attributes {stable_mosaic.version = 11 : i64} {
  func.func @_bn_relu_nchw_kernel(%arg0: i32, %arg1: i32, %arg2: memref<1x64x128xf32, #tpu.memory_space<vmem>>, %arg3: memref<2x128xf32, #tpu.memory_space<vmem>>, %arg4: memref<1x8x64xf32, #tpu.memory_space<vmem>>) attributes {dimension_semantics = [#tpu.dimension_semantics<parallel>, #tpu.dimension_semantics<parallel>], iteration_bounds = array<i64: 2, 1>, scalar_prefetch = 0 : i64, scratch_operands = 0 : i64, tpu.core_type = #tpu.core_type<tc>, window_params = [{transform_indices = @transform_0, window_bounds = array<i64: 1, 64, 128>}, {pipeline_mode = #tpu.pipeline_mode<synchronous>, transform_indices = @transform_1, window_bounds = array<i64: 2, 128>}, {transform_indices = @transform_2, window_bounds = array<i64: 1, 8, 64>}]} {
    %c0 = arith.constant 0 : index
    %c0_0 = arith.constant 0 : index
    %c0_1 = arith.constant 0 : index
    %0 = vector.load %arg2[%c0, %c0_0, %c0_1] : memref<1x64x128xf32, #tpu.memory_space<vmem>>, vector<1x64x128xf32>
    %1 = vector.shape_cast %0 : vector<1x64x128xf32> to vector<64x128xf32>
    %c0_2 = arith.constant 0 : index
    %c0_3 = arith.constant 0 : index
    %2 = vector.load %arg3[%c0_2, %c0_3] : memref<2x128xf32, #tpu.memory_space<vmem>>, vector<1x128xf32>
    %3 = vector.broadcast %2 : vector<1x128xf32> to vector<64x128xf32>
    %4 = arith.mulf %1, %3 : vector<64x128xf32>
    %c1 = arith.constant 1 : index
    %c0_4 = arith.constant 0 : index
    %5 = vector.load %arg3[%c1, %c0_4] : memref<2x128xf32, #tpu.memory_space<vmem>>, vector<1x128xf32>
    %6 = vector.broadcast %5 : vector<1x128xf32> to vector<64x128xf32>
    %7 = arith.addf %4, %6 : vector<64x128xf32>
    %cst = arith.constant 0.000000e+00 : f32
    %8 = vector.broadcast %cst : f32 to vector<64x128xf32>
    %9 = arith.maximumf %7, %8 : vector<64x128xf32>
    %10 = tpu.transpose %9, [1, 0] : vector<64x128xf32> -> vector<128x64xf32>
    %11 = vector.extract_strided_slice %10 {offsets = [0, 0], sizes = [8, 64], strides = [1, 1]} : vector<128x64xf32> to vector<8x64xf32>
    %c0_5 = arith.constant 0 : index
    %c0_6 = arith.constant 0 : index
    %c0_7 = arith.constant 0 : index
    %12 = vector.load %arg4[%c0_5, %c0_6, %c0_7] : memref<1x8x64xf32, #tpu.memory_space<vmem>>, vector<1x8x64xf32>
    %13 = vector.shape_cast %12 : vector<1x8x64xf32> to vector<8x64xf32>
    %14 = vector.shape_cast %11 : vector<8x64xf32> to vector<1x8x64xf32>
    tpu.vector_store %arg4[%c0_5, %c0_6, %c0_7], %14 {strides = array<i32>} : memref<1x8x64xf32, #tpu.memory_space<vmem>>, vector<1x8x64xf32>,
    return
  }
  func.func @transform_0(%arg0: i32, %arg1: i32) -> (i32, i32, i32) {
    %c0_i32 = arith.constant 0 : i32
    %c0_i32_0 = arith.constant 0 : i32
    return %arg0, %arg1, %c0_i32 : i32, i32, i32
  }
  func.func @transform_1(%arg0: i32, %arg1: i32) -> (i32, i32) {
    %c0_i32 = arith.constant 0 : i32
    %c0_i32_0 = arith.constant 0 : i32
    %c0_i32_1 = arith.constant 0 : i32
    return %c0_i32, %c0_i32_0 : i32, i32
  }
  func.func @transform_2(%arg0: i32, %arg1: i32) -> (i32, i32, i32) {
    %c0_i32 = arith.constant 0 : i32
    %c0_i32_0 = arith.constant 0 : i32
    return %arg0, %c0_i32, %arg1 : i32, i32, i32
  }
}

</mosaic_0001>

<bundles_post_ra>
// kernel: conv_block_wo_maxpooling.5
= control target key start
LH: loop header
LB: loop body
LE: loop exit
PB: predicated region body
PF: predicated region fallthrough
CT: control target
= control target key end

     0   :  { %s408_s9 = smov 0   ;;  %s410_s10 = smov 0   ;;  %s461_s0 = inlined_call_operand.vmem [shape: f32[2,64,128], index: 0, kind: input, shape index: {}]   ;;  %s462_s1 = inlined_call_operand.vmem [shape: f32[2,128], index: 1, kind: input, shape index: {}]   ;;  %s463_s2 = inlined_call_operand.vmem [shape: f32[2,8,64], index: 2, kind: output, shape index: {}]  }
   0x1   :  { %s412_s11 = smov 0  }
   0x2 LB: > { %s24_s12 = sadd.s32 1, %s387_s10  ;;  %p335_p0 = scmp.ge.s32.totalorder %s391_s11, 1  ;;  %s391_s11 = sphi %s412_s11, %s12_s11   ;;  %s387_s10 = sphi %s410_s10, %s465_s10   ;;  %s383_s9 = sphi %s408_s9, %s464_s9  }
   0x3   : > { %p26_p1 = scmp.ge.s32.totalorder %s24_s12, 2  ;;  %p133_p2 = scmp.lt.s32.totalorder %s391_s11, 3 }
   0x5   : > { %s467_s12 = smov (%p26_p1, %s24_s12), 0  ;;  %p134_p3 = pnand %p335_p0, %p133_p2 }
   0x6   : > { %p162_p4 = scmp.lt.s32.totalorder (!%p134_p3), %s383_s9, 1 }
   0x7   : > { %137 = sbr.rel (%p134_p3) target bundleno = 148 (0x94), region = 28 }
   0xc   : > { %s469_s9 = smov (!%p162_p4, %s383_s9), 1  ;;  %v339_v0 = vld [vmem:[%s462_s1] ss:$0 sm:$0xff]  ;;  %v340_v1 = vld [vmem:[%s462_s1 + $0x1] ss:$0 sm:$0xff]  ;;  %vm252_vm0 = vcmask 523264  }
   0xd   : > { %s343_s13 = sshll.u32 %s469_s9, 6  ;;  %s338_s21 = sshll.u32 %s469_s9, 3 }
   0xe   : > { %s435_s18 = scalar_lea.vmem %s461_s0, %s343_s13  ;;  %s177_s24 = scalar_lea.vmem %s463_s2, %s338_s21 }
   0xf   : > { %v178_v2 = vld [vmem:[%s435_s18] sm:$0xff]  ;;  %v179_v3 = vld [vmem:[%s435_s18 + $0x8] sm:$0xff]  ;;  %v180_v4 = vld [vmem:[%s435_s18 + $0x10] sm:$0xff] }
  0x10   : > { %v191_v5 = vmul.f32 %v339_v0, %v178_v2  ;;  %v192_v6 = vmul.f32 %v339_v0, %v179_v3  ;;  %v193_v9 = vmul.f32 %v339_v0, %v180_v4  ;;  %v181_v10 = vld [vmem:[%s435_s18 + $0x18] sm:$0xff]  ;;  %v182_v15 = vld [vmem:[%s435_s18 + $0x20] sm:$0xff]  ;;  %v183_v19 = vld [vmem:[%s435_s18 + $0x28] sm:$0xff] }
  0x11   : > { %v194_v14 = vmul.f32 %v339_v0, %v181_v10  ;;  %v195_v18 = vmul.f32 %v339_v0, %v182_v15  ;;  %v196_v22 = vmul.f32 %v339_v0, %v183_v19  ;;  %v184_v23 = vld [vmem:[%s435_s18 + $0x30] sm:$0xff]  ;;  %v185_v27 = vld [vmem:[%s435_s18 + $0x38] sm:$0xff] }
  0x12   : > { %v204_v7 = vadd.f32 %v340_v1, %v191_v5  ;;  %v205_v8 = vadd.f32 %v340_v1, %v192_v6  ;;  %v206_v13 = vadd.f32 %v340_v1, %v193_v9  ;;  %v197_v26 = vmul.f32 %v339_v0, %v184_v23 }
  0x13   : > { %v207_v17 = vadd.f32 %v340_v1, %v194_v14  ;;  %v208_v21 = vadd.f32 %v340_v1, %v195_v18  ;;  %v209_v25 = vadd.f32 %v340_v1, %v196_v22  ;;  %v198_v30 = vmul.f32 %v339_v0, %v185_v27 }
  0x14   : > { %v212_v11 = vmax.f32 %v204_v7, 0.0  ;;  %v213_v12 = vmax.f32 %v205_v8, 0.0  ;;  %v214_v16 = vmax.f32 %v206_v13, 0.0  ;;  %v210_v29 = vadd.f32 %v340_v1, %v197_v26 }
  0x15   : > { %v215_v20 = vmax.f32 %v207_v17, 0.0  ;;  %v216_v24 = vmax.f32 %v208_v21, 0.0  ;;  %v217_v28 = vmax.f32 %v209_v25, 0.0  ;;  %v211_v32 = vadd.f32 %v340_v1, %v198_v30 }
  0x16   : > { %220 = vxpose.xlu0.b32.start [1/8] (short) (narrow) %v212_v11, 8  ;;  %v218_v31 = vmax.f32 %v210_v29, 0.0 }
  0x17   : > { %v219_v33 = vmax.f32 %v211_v32, 0.0 }
  0x1a   : > { %221 = vxpose.xlu0.b32.cont [2/8] (short) (narrow) %v213_v12, 8 }
  0x1e   : > { %222 = vxpose.xlu0.b32.cont [3/8] (short) (narrow) %v214_v16, 8 }
  0x22   : > { %223 = vxpose.xlu0.b32.cont [4/8] (short) (narrow) %v215_v20, 8 }
  0x26   : > { %224 = vxpose.xlu0.b32.cont [5/8] (short) (narrow) %v216_v24, 8 }
  0x2a   : > { %225 = vxpose.xlu0.b32.cont [6/8] (short) (narrow) %v217_v28, 8 }
  0x2e   : > { %226 = vxpose.xlu0.b32.cont [7/8] (short) (narrow) %v218_v31, 8 }
  0x32   : > { %227 = vxpose.xlu0.b32.end [8/8] (short) (narrow) %v219_v33, 8 }
  0x92   : > { %v236_v34 = vpop.trf.xlu0 }
  0x93   : > { %253 = vst.msk [vmem:[%s177_s24] sm:$0xff] %vm252_vm0, %v236_v34 }
  0x94 PF: > { %s12_s11 = sadd.s32 1, %s391_s11   ;;  %s464_s9 = smov %s387_s10 }
  0x95   : > { %p9_p5 = scmp.ge.s32.totalorder %s12_s11, 4   ;;  %s465_s10 = smov %s467_s12 }
  0x97   :  { %11 = sbr.rel (!%p9_p5) target bundleno = 2 (0x2), region = 58 }

// kernel: conv_block_wo_maxpooling.4
= control target key start
LH: loop header
LB: loop body
LE: loop exit
PB: predicated region body
PF: predicated region fallthrough
CT: control target
= control target key end

     0   :  { %s674_s2 = inlined_call_operand.vmem [shape: f32[128,128], index: 2, kind: input, shape index: {}]   ;;  %s675_s0 = inlined_call_operand.vmem [shape: f32[128,128], index: 0, kind: input, shape index: {}]   ;;  %s676_s1 = inlined_call_operand.vmem [shape: f32[2,128], index: 1, kind: input, shape index: {}]   ;;  %s677_s3 = inlined_call_operand.vmem [shape: f32[128,128], index: 3, kind: output, shape index: {0}]   ;;  %s678_s4 = inlined_call_operand.vmem [shape: f32[1,2,128], index: 4, kind: output, shape index: {1}]  }
   0x1   :  { %v105_v0 = vld [vmem:[%s674_s2 + $0x78] sm:$0xff]  ;;  %v104_v1 = vld [vmem:[%s674_s2 + $0x70] sm:$0xff]  ;;  %v103_v2 = vld [vmem:[%s674_s2 + $0x68] sm:$0xff] }
   0x2   :  { %369 = vmatprep.subr.mxu0 %v105_v0  ;;  %425 = vmatprep.subr.mxu1 %v105_v0  ;;  %v102_v3 = vld [vmem:[%s674_s2 + $0x60] sm:$0xff]  ;;  %v101_v6 = vld [vmem:[%s674_s2 + $0x58] sm:$0xff]  ;;  %v100_v8 = vld [vmem:[%s674_s2 + $0x50] sm:$0xff] }
   0x3   :  { %370 = vmatpush3.msra.mxu0 %v105_v0  ;;  %441 = vmatpush3.msra.mxu1 %v105_v0  ;;  %v16_v4 = vld [vmem:[%s675_s0] sm:$0xff]  ;;  %v99_v10 = vld [vmem:[%s674_s2 + $0x48] sm:$0xff]  ;;  %v97_v13 = vld [vmem:[%s674_s2 + $0x38] sm:$0xff] }
   0x4   :  { %371 = vmatprep.subr.mxu0 %v104_v1  ;;  %426 = vmatprep.subr.mxu1 %v104_v1  ;;  %v500_v5 = vld [vmem:[%s676_s1] ss:$0 sm:$0xff]  ;;  %v512_v9 = vld [vmem:[%s676_s1 + $0x1] ss:$0 sm:$0xff]  ;;  %v96_v15 = vld [vmem:[%s674_s2 + $0x30] sm:$0xff] }
   0x5   :  { %372 = vmatpush3.msra.mxu0 %v104_v1  ;;  %442 = vmatpush3.msra.mxu1 %v104_v1  ;;  %v37_v7 = vmul.f32 %v500_v5, %v16_v4  ;;  %v98_v12 = vld [vmem:[%s674_s2 + $0x40] sm:$0xff]  ;;  %v95_v16 = vld [vmem:[%s674_s2 + $0x28] sm:$0xff]  ;;  %v18_v18 = vld [vmem:[%s675_s0 + $0x10] sm:$0xff] }
   0x6   :  { %373 = vmatprep.subr.mxu0 %v103_v2  ;;  %427 = vmatprep.subr.mxu1 %v103_v2  ;;  %v17_v17 = vld [vmem:[%s675_s0 + $0x8] sm:$0xff]  ;;  %v24_v19 = vld [vmem:[%s675_s0 + $0x40] sm:$0xff]  ;;  %v26_v23 = vld [vmem:[%s675_s0 + $0x50] sm:$0xff]  ;;  %v39_v25 = vmul.f32 %v500_v5, %v18_v18 }
   0x7   :  { %374 = vmatpush3.msra.mxu0 %v103_v2  ;;  %443 = vmatpush3.msra.mxu1 %v103_v2  ;;  %v58_v11 = vadd.f32 %v512_v9, %v37_v7  ;;  %v94_v20 = vld [vmem:[%s674_s2 + $0x20] sm:$0xff]  ;;  %v25_v21 = vld [vmem:[%s675_s0 + $0x48] sm:$0xff]  ;;  %v38_v22 = vmul.f32 %v500_v5, %v17_v17  ;;  %v93_v24 = vld [vmem:[%s674_s2 + $0x18] sm:$0xff]  ;;  %v45_v27 = vmul.f32 %v500_v5, %v24_v19 }
   0x8   :  { %375 = vmatprep.subr.mxu0 %v102_v3  ;;  %428 = vmatprep.subr.mxu1 %v102_v3  ;;  %v19_v26 = vld [vmem:[%s675_s0 + $0x18] sm:$0xff]  ;;  %v20_v28 = vld [vmem:[%s675_s0 + $0x20] sm:$0xff]  ;;  %v46_v29 = vmul.f32 %v500_v5, %v25_v21  ;;  %v92_v30 = vld [vmem:[%s674_s2 + $0x10] sm:$0xff]  ;;  %v47_v31 = vmul.f32 %v500_v5, %v26_v23  ;;  %v60_v37 = vadd.f32 %v512_v9, %v39_v25 }
   0x9   :  { %376 = vmatpush3.msra.mxu0 %v102_v3  ;;  %444 = vmatpush3.msra.mxu1 %v102_v3  ;;  %v74_v14 = vmax.f32 %v58_v11, 0.0  ;;  %v27_v32 = vld [vmem:[%s675_s0 + $0x58] sm:$0xff]  ;;  %v59_v33 = vadd.f32 %v512_v9, %v38_v22  ;;  %v40_v34 = vmul.f32 %v500_v5, %v19_v26  ;;  %v28_v35 = vld [vmem:[%s675_s0 + $0x60] sm:$0xff]  ;;  %v91_v36 = vld [vmem:[%s674_s2 + $0x8] sm:$0xff]  ;;  %v41_v38 = vmul.f32 %v500_v5, %v20_v28 }
   0xa   :  { %377 = vmatprep.subr.mxu0 %v101_v6  ;;  %429 = vmatprep.subr.mxu1 %v101_v6  ;;  %v21_v39 = vld [vmem:[%s675_s0 + $0x28] sm:$0xff]  ;;  %v66_v40 = vadd.f32 %v512_v9, %v45_v27  ;;  %v22_v41 = vld [vmem:[%s675_s0 + $0x30] sm:$0xff]  ;;  %v67_v42 = vadd.f32 %v512_v9, %v46_v29  ;;  %v48_v43 = vmul.f32 %v500_v5, %v27_v32  ;;  %v90_v44 = vld [vmem:[%s674_s2] sm:$0xff]  ;;  %v76_v52 = vmax.f32 %v60_v37, 0.0 }
   0xb   :  { %378 = vmatpush3.msra.mxu0 %v101_v6  ;;  %445 = vmatpush3.msra.mxu1 %v101_v6  ;;  %v68_v45 = vadd.f32 %v512_v9, %v47_v31  ;;  %v49_v46 = vmul.f32 %v500_v5, %v28_v35  ;;  %v29_v47 = vld [vmem:[%s675_s0 + $0x68] sm:$0xff]  ;;  %v75_v48 = vmax.f32 %v59_v33, 0.0  ;;  %v61_v49 = vadd.f32 %v512_v9, %v40_v34  ;;  %v30_v51 = vld [vmem:[%s675_s0 + $0x70] sm:$0xff]  ;;  %v23_v55 = vld [vmem:[%s675_s0 + $0x38] sm:$0xff] }
   0xc   :  { %379 = vmatprep.subr.mxu0 %v100_v8  ;;  %430 = vmatprep.subr.mxu1 %v100_v8  ;;  %v42_v50 = vmul.f32 %v500_v5, %v21_v39  ;;  %v62_v53 = vadd.f32 %v512_v9, %v41_v38  ;;  %v43_v54 = vmul.f32 %v500_v5, %v22_v41  ;;  %v82_v56 = vmax.f32 %v66_v40, 0.0  ;;  %v31_v63 = vld [vmem:[%s675_s0 + $0x78] sm:$0xff] }
   0xd   :  { %380 = vmatpush3.msra.mxu0 %v100_v8  ;;  %446 = vmatpush3.msra.mxu1 %v100_v8  ;;  %v83_v57 = vmax.f32 %v67_v42, 0.0  ;;  %v69_v58 = vadd.f32 %v512_v9, %v48_v43  ;;  %v50_v59 = vmul.f32 %v500_v5, %v29_v47  ;;  %v84_v60 = vmax.f32 %v68_v45, 0.0 }
   0xe   :  { %381 = vmatprep.subr.mxu0 %v99_v10  ;;  %431 = vmatprep.subr.mxu1 %v99_v10  ;;  %v70_v61 = vadd.f32 %v512_v9, %v49_v46  ;;  %v51_v62 = vmul.f32 %v500_v5, %v30_v51  ;;  %v77_v0 = vmax.f32 %v61_v49, 0.0  ;;  %v63_v1 = vadd.f32 %v512_v9, %v42_v50 }
   0xf   :  { %382 = vmatpush3.msra.mxu0 %v99_v10  ;;  %447 = vmatpush3.msra.mxu1 %v99_v10  ;;  %v44_v2 = vmul.f32 %v500_v5, %v23_v55  ;;  %v78_v3 = vmax.f32 %v62_v53, 0.0  ;;  %v64_v4 = vadd.f32 %v512_v9, %v43_v54  ;;  %v85_v6 = vmax.f32 %v69_v58, 0.0 }
  0x10   :  { %383 = vmatprep.subr.mxu0 %v98_v12  ;;  %432 = vmatprep.subr.mxu1 %v98_v12  ;;  %v71_v7 = vadd.f32 %v512_v9, %v50_v59  ;;  %v52_v8 = vmul.f32 %v500_v5, %v31_v63  ;;  %v86_v10 = vmax.f32 %v70_v61, 0.0  ;;  %v72_v11 = vadd.f32 %v512_v9, %v51_v62 }
  0x11   :  { %384 = vmatpush3.msra.mxu0 %v98_v12  ;;  %448 = vmatpush3.msra.mxu1 %v98_v12  ;;  %v79_v12 = vmax.f32 %v63_v1, 0.0 }
  0x12   :  { %385 = vmatprep.subr.mxu0 %v97_v13  ;;  %433 = vmatprep.subr.mxu1 %v97_v13  ;;  %v88_v17 = vmax.f32 %v72_v11, 0.0 }
  0x13   :  { %386 = vmatpush3.msra.mxu0 %v97_v13  ;;  %449 = vmatpush3.msra.mxu1 %v97_v13  ;;  %v65_v13 = vadd.f32 %v512_v9, %v44_v2 }
  0x14   :  { %387 = vmatprep.subr.mxu0 %v96_v15  ;;  %401 = vmatprep.mubr.f32.mxu0 %v74_v14  ;;  %v80_v14 = vmax.f32 %v64_v4, 0.0 }
  0x15   :  { %388 = vmatpush3.msra.mxu0 %v96_v15  ;;  %434 = vmatprep.subr.mxu1 %v96_v15  ;;  %v81_v18 = vmax.f32 %v65_v13, 0.0 }
  0x16   :  { %389 = vmatprep.subr.mxu0 %v95_v16  ;;  %450 = vmatpush3.msra.mxu1 %v96_v15  ;;  %v87_v15 = vmax.f32 %v71_v7, 0.0 }
  0x17   :  { %390 = vmatpush3.msra.mxu0 %v95_v16  ;;  %435 = vmatprep.subr.mxu1 %v95_v16 }
  0x18   :  { %391 = vmatprep.subr.mxu0 %v94_v20  ;;  %451 = vmatpush3.msra.mxu1 %v95_v16  ;;  %v73_v16 = vadd.f32 %v512_v9, %v52_v8 }
  0x19   :  { %392 = vmatpush3.msra.mxu0 %v94_v20  ;;  %436 = vmatprep.subr.mxu1 %v94_v20 }
  0x1a   :  { %393 = vmatprep.subr.mxu0 %v93_v24  ;;  %452 = vmatpush3.msra.mxu1 %v94_v20  ;;  %v89_v5 = vmax.f32 %v73_v16, 0.0 }
  0x1b   :  { %394 = vmatpush3.msra.mxu0 %v93_v24  ;;  %437 = vmatprep.subr.mxu1 %v93_v24 }
  0x1c   :  { %395 = vmatprep.subr.mxu0 %v92_v30  ;;  %453 = vmatpush3.msra.mxu1 %v93_v24 }
  0x1d   :  { %396 = vmatpush3.msra.mxu0 %v92_v30  ;;  %438 = vmatprep.subr.mxu1 %v92_v30 }
  0x1e   :  { %397 = vmatprep.subr.mxu0 %v91_v36  ;;  %454 = vmatpush3.msra.mxu1 %v92_v30 }
  0x1f   :  { %398 = vmatpush3.msra.mxu0 %v91_v36  ;;  %439 = vmatprep.subr.mxu1 %v91_v36 }
  0x20   :  { %399 = vmatprep.subr.mxu0 %v90_v44  ;;  %455 = vmatpush3.msra.mxu1 %v91_v36 }
  0x21   :  { %400 = vmatpush3.msra.mxu0 %v90_v44  ;;  %440 = vmatprep.subr.mxu1 %v90_v44 }
  0x22   :  { %402 = vmatmul.mubr.f32.vlgmr.msra.gmra.mxu0 %v75_v48  ;;  %456 = vmatpush3.msra.mxu1 %v90_v44 }
  0x23   :  { %404 = vmatprep.mubr.f32.mxu0 %v76_v52  ;;  %413 = vmatprep.mubr.f32.mxu1 %v82_v56 }
  0x24   :  { %414 = vmatmul.mubr.f32.vlgmr.msra.gmra.mxu1 %v83_v57 }
  0x25   :  { %416 = vmatprep.mubr.f32.mxu1 %v84_v60 }
  0x26   :  { %405 = vmatmul.mubr.f32.gmra.mxu0 %v77_v0 }
  0x27   :  { %407 = vmatprep.mubr.f32.mxu0 %v78_v3 }
  0x28   :  { %417 = vmatmul.mubr.f32.gmra.mxu1 %v85_v6 }
  0x29   :  { %419 = vmatprep.mubr.f32.mxu1 %v86_v10 }
  0x2a   :  { %408 = vmatmul.mubr.f32.gmra.mxu0 %v79_v12 }
  0x2b   :  { %410 = vmatprep.mubr.f32.mxu0 %v80_v14 }
  0x2c   :  { %420 = vmatmul.mubr.f32.gmra.mxu1 %v87_v15 }
  0x2d   :  { %422 = vmatprep.mubr.f32.mxu1 %v88_v17 }
  0x2e   :  { %411 = vmatmul.mubr.f32.gmra.mxu0 %v81_v18 }
  0x30   :  { %423 = vmatmul.mubr.f32.gmra.mxu1 %v89_v5 }
  0xe2   :  { %v403_v19 = vpop.f32.mrf.mxu0 }
  0xe3   :  { %252 = vst [vmem:[%s677_s3 + $0x8] sm:$0xff] %v403_v19  ;;  %v290_v24 = vmul.f32 %v403_v19, %v403_v19 }
  0xe4   :  { %v172_v20 = vpop.f32.mrf.mxu0  ;;  %v415_v21 = vpop.f32.mrf.mxu1 }
  0xe5   :  { %251 = vst [vmem:[%s677_s3] sm:$0xff] %v172_v20  ;;  %v289_v9 = vmul.f32 %v172_v20, %v172_v20  ;;  %260 = vst [vmem:[%s677_s3 + $0x48] sm:$0xff] %v415_v21  ;;  %v267_v25 = vadd.f32 %v403_v19, %v172_v20  ;;  %v298_v58 = vmul.f32 %v415_v21, %v415_v21 }
  0xe6   :  { %v406_v22 = vpop.f32.mrf.mxu0  ;;  %v212_v23 = vpop.f32.mrf.mxu1 }
  0xe7   :  { %254 = vst [vmem:[%s677_s3 + $0x18] sm:$0xff] %v406_v22  ;;  %259 = vst [vmem:[%s677_s3 + $0x40] sm:$0xff] %v212_v23  ;;  %v305_v28 = vadd.f32 %v290_v24, %v289_v9  ;;  %v292_v33 = vmul.f32 %v406_v22, %v406_v22  ;;  %v297_v57 = vmul.f32 %v212_v23, %v212_v23 }
  0xe8   :  { %v182_v26 = vpop.f32.mrf.mxu0  ;;  %v418_v27 = vpop.f32.mrf.mxu1 }
  0xe9   :  { %253 = vst [vmem:[%s677_s3 + $0x10] sm:$0xff] %v182_v26  ;;  %v268_v29 = vadd.f32 %v267_v25, %v182_v26  ;;  %v291_v30 = vmul.f32 %v182_v26, %v182_v26  ;;  %262 = vst [vmem:[%s677_s3 + $0x58] sm:$0xff] %v418_v27  ;;  %v300_v0 = vmul.f32 %v418_v27, %v418_v27 }
  0xea   :  { %v409_v31 = vpop.f32.mrf.mxu0  ;;  %v222_v32 = vpop.f32.mrf.mxu1 }
  0xeb   :  { %v306_v34 = vadd.f32 %v305_v28, %v291_v30  ;;  %256 = vst [vmem:[%s677_s3 + $0x28] sm:$0xff] %v409_v31  ;;  %v269_v35 = vadd.f32 %v406_v22, %v268_v29  ;;  %261 = vst [vmem:[%s677_s3 + $0x50] sm:$0xff] %v222_v32  ;;  %v294_v43 = vmul.f32 %v409_v31, %v409_v31 }
  0xec   :  { %v192_v36 = vpop.f32.mrf.mxu0  ;;  %v421_v37 = vpop.f32.mrf.mxu1  ;;  %v299_v62 = vmul.f32 %v222_v32, %v222_v32 }
  0xed   :  { %255 = vst [vmem:[%s677_s3 + $0x20] sm:$0xff] %v192_v36  ;;  %v270_v38 = vadd.f32 %v269_v35, %v192_v36  ;;  %v293_v39 = vmul.f32 %v192_v36, %v192_v36  ;;  %v307_v40 = vadd.f32 %v306_v34, %v292_v33  ;;  %264 = vst [vmem:[%s677_s3 + $0x68] sm:$0xff] %v421_v37 }
  0xee   :  { %v412_v41 = vpop.f32.mrf.mxu0  ;;  %v232_v42 = vpop.f32.mrf.mxu1  ;;  %v302_v7 = vmul.f32 %v421_v37, %v421_v37 }
  0xef   :  { %v308_v44 = vadd.f32 %v307_v40, %v293_v39  ;;  %258 = vst [vmem:[%s677_s3 + $0x38] sm:$0xff] %v412_v41  ;;  %v271_v45 = vadd.f32 %v409_v31, %v270_v38  ;;  %263 = vst [vmem:[%s677_s3 + $0x60] sm:$0xff] %v232_v42  ;;  %v296_v52 = vmul.f32 %v412_v41, %v412_v41 }
  0xf0   :  { %v202_v46 = vpop.f32.mrf.mxu0  ;;  %v424_v47 = vpop.f32.mrf.mxu1  ;;  %v301_v4 = vmul.f32 %v232_v42, %v232_v42 }
  0xf1   :  { %257 = vst [vmem:[%s677_s3 + $0x30] sm:$0xff] %v202_v46  ;;  %v272_v48 = vadd.f32 %v271_v45, %v202_v46  ;;  %v295_v49 = vmul.f32 %v202_v46, %v202_v46  ;;  %v309_v50 = vadd.f32 %v308_v44, %v294_v43  ;;  %266 = vst [vmem:[%s677_s3 + $0x78] sm:$0xff] %v424_v47 }
  0xf2   :  { %v242_v51 = vpop.f32.mrf.mxu1  ;;  %v304_v14 = vmul.f32 %v424_v47, %v424_v47 }
  0xf3   :  { %v273_v53 = vadd.f32 %v412_v41, %v272_v48  ;;  %v310_v54 = vadd.f32 %v309_v50, %v295_v49  ;;  %265 = vst [vmem:[%s677_s3 + $0x70] sm:$0xff] %v242_v51  ;;  %v303_v12 = vmul.f32 %v242_v51, %v242_v51 }
  0xf5   :  { %v311_v55 = vadd.f32 %v310_v54, %v296_v52  ;;  %v274_v56 = vadd.f32 %v273_v53, %v212_v23 }
  0xf7   :  { %v312_v59 = vadd.f32 %v311_v55, %v297_v57  ;;  %v275_v60 = vadd.f32 %v415_v21, %v274_v56 }
  0xf9   :  { %v276_v61 = vadd.f32 %v275_v60, %v222_v32  ;;  %v313_v63 = vadd.f32 %v312_v59, %v298_v58 }
  0xfb   :  { %v314_v1 = vadd.f32 %v313_v63, %v299_v62  ;;  %v277_v2 = vadd.f32 %v418_v27, %v276_v61 }
  0xfd   :  { %v278_v3 = vadd.f32 %v277_v2, %v232_v42  ;;  %v315_v6 = vadd.f32 %v314_v1, %v300_v0 }
  0xff   :  { %v316_v8 = vadd.f32 %v315_v6, %v301_v4  ;;  %v279_v10 = vadd.f32 %v421_v37, %v278_v3 }
 0x101   :  { %v280_v11 = vadd.f32 %v279_v10, %v242_v51  ;;  %v317_v13 = vadd.f32 %v316_v8, %v302_v7 }
 0x103   :  { %v281_v15 = vadd.f32 %v424_v47, %v280_v11  ;;  %v318_v16 = vadd.f32 %v317_v13, %v303_v12 }
 0x105   :  { %v282_v17 = vrot.slane %v281_v15, 4  ;;  %v319_v18 = vadd.f32 %v318_v16, %v304_v14 }
 0x107   :  { %v283_v5 = vadd.f32 %v282_v17, %v281_v15  ;;  %v320_v19 = vrot.slane %v319_v18, 4 }
 0x109   :  { %v284_v20 = vrot.slane %v283_v5, 2  ;;  %v321_v21 = vadd.f32 %v320_v19, %v319_v18 }
 0x10b   :  { %v285_v9 = vadd.f32 %v284_v20, %v283_v5  ;;  %v322_v22 = vrot.slane %v321_v21, 2 }
 0x10d   :  { %v286_v23 = vrot.slane %v285_v9, 1  ;;  %v323_v24 = vadd.f32 %v322_v22, %v321_v21 }
 0x10f   :  { %v287_v25 = vadd.f32 %v286_v23, %v285_v9  ;;  %v324_v26 = vrot.slane %v323_v24, 1 }
 0x111   :  { %288 = vst [vmem:[%s678_s4] sm:$0x1] %v287_v25  ;;  %v325_v27 = vadd.f32 %v324_v26, %v323_v24 }
 0x113   :  { %326 = vst [vmem:[%s678_s4 + $0x1] sm:$0x1] %v325_v27 }

// kernel: conv_block_wo_maxpooling.3
= control target key start
LH: loop header
LB: loop body
LE: loop exit
PB: predicated region body
PF: predicated region fallthrough
CT: control target
= control target key end

     0   :  { %vm34_vm0 = vcmask 326656   ;;  %s546_s1 = inlined_call_operand.vmem [shape: f32[40,128], index: 1, kind: input, shape index: {}]   ;;  %s547_s0 = inlined_call_operand.vmem [shape: f32[128,40], index: 0, kind: input, shape index: {}]   ;;  %s548_s2 = inlined_call_operand.vmem [shape: f32[128,128], index: 2, kind: output, shape index: {0}]   ;;  %s549_s3 = inlined_call_operand.vmem [shape: f32[1,2,128], index: 3, kind: output, shape index: {1}]  }
   0x1   :  { %v33_v0 = vld [vmem:[%s546_s1 + $0x20] sm:$0xff]  ;;  %v32_v1 = vld [vmem:[%s546_s1 + $0x18] sm:$0xff]  ;;  %v31_v3 = vld [vmem:[%s546_s1 + $0x10] sm:$0xff] }
   0x2   :  { %349 = vmatprep.subr.mxu0 %v33_v0  ;;  %v13_v2 = vld [vmem:[%s547_s0] sm:$0xff]  ;;  %383 = vmatprep.subr.mxu1 %v33_v0  ;;  %v30_v4 = vld [vmem:[%s546_s1 + $0x8] sm:$0xff]  ;;  %v15_v7 = vld [vmem:[%s547_s0 + $0x10] sm:$0xff] }
   0x3   :  { %350 = vmatpush3.msra.mxu0 %v33_v0  ;;  %359 = vmatprep.mubr.msk.f32.mxu0 %vm34_vm0, %v13_v2  ;;  %v29_v5 = vld [vmem:[%s546_s1] sm:$0xff]  ;;  %v14_v6 = vld [vmem:[%s547_s0 + $0x8] sm:$0xff]  ;;  %v23_v10 = vld [vmem:[%s547_s0 + $0x50] sm:$0xff] }
   0x4   :  { %351 = vmatprep.subr.mxu0 %v32_v1  ;;  %388 = vmatpush3.msra.mxu1 %v33_v0  ;;  %v21_v8 = vld [vmem:[%s547_s0 + $0x40] sm:$0xff]  ;;  %v22_v9 = vld [vmem:[%s547_s0 + $0x48] sm:$0xff]  ;;  %v16_v11 = vld [vmem:[%s547_s0 + $0x18] sm:$0xff] }
   0x5   :  { %352 = vmatpush3.msra.mxu0 %v32_v1  ;;  %384 = vmatprep.subr.mxu1 %v32_v1  ;;  %v17_v12 = vld [vmem:[%s547_s0 + $0x20] sm:$0xff]  ;;  %v24_v13 = vld [vmem:[%s547_s0 + $0x58] sm:$0xff]  ;;  %v18_v15 = vld [vmem:[%s547_s0 + $0x28] sm:$0xff] }
   0x6   :  { %353 = vmatprep.subr.mxu0 %v31_v3  ;;  %389 = vmatpush3.msra.mxu1 %v32_v1  ;;  %v25_v14 = vld [vmem:[%s547_s0 + $0x60] sm:$0xff]  ;;  %v19_v16 = vld [vmem:[%s547_s0 + $0x30] sm:$0xff]  ;;  %v26_v17 = vld [vmem:[%s547_s0 + $0x68] sm:$0xff] }
   0x7   :  { %354 = vmatpush3.msra.mxu0 %v31_v3  ;;  %385 = vmatprep.subr.mxu1 %v31_v3  ;;  %v27_v18 = vld [vmem:[%s547_s0 + $0x70] sm:$0xff]  ;;  %v20_v19 = vld [vmem:[%s547_s0 + $0x38] sm:$0xff] }
   0x8   :  { %355 = vmatprep.subr.mxu0 %v30_v4  ;;  %390 = vmatpush3.msra.mxu1 %v31_v3  ;;  %v28_v20 = vld [vmem:[%s547_s0 + $0x78] sm:$0xff] }
   0x9   :  { %356 = vmatpush3.msra.mxu0 %v30_v4  ;;  %386 = vmatprep.subr.mxu1 %v30_v4 }
   0xa   :  { %357 = vmatprep.subr.mxu0 %v29_v5  ;;  %391 = vmatpush3.msra.mxu1 %v30_v4 }
   0xb   :  { %358 = vmatpush3.msra.mxu0 %v29_v5  ;;  %387 = vmatprep.subr.mxu1 %v29_v5 }
   0xc   :  { %360 = vmatmul.mubr.msk.f32.vlgmr.msra.gmra.mxu0 %vm34_vm0, %v14_v6  ;;  %392 = vmatpush3.msra.mxu1 %v29_v5 }
   0xd   :  { %362 = vmatprep.mubr.msk.f32.mxu0 %vm34_vm0, %v15_v7  ;;  %371 = vmatprep.mubr.msk.f32.mxu1 %vm34_vm0, %v21_v8 }
   0xe   :  { %372 = vmatmul.mubr.msk.f32.vlgmr.msra.gmra.mxu1 %vm34_vm0, %v22_v9 }
   0xf   :  { %374 = vmatprep.mubr.msk.f32.mxu1 %vm34_vm0, %v23_v10 }
  0x10   :  { %363 = vmatmul.mubr.msk.f32.gmra.mxu0 %vm34_vm0, %v16_v11 }
  0x11   :  { %365 = vmatprep.mubr.msk.f32.mxu0 %vm34_vm0, %v17_v12 }
  0x12   :  { %375 = vmatmul.mubr.msk.f32.gmra.mxu1 %vm34_vm0, %v24_v13 }
  0x13   :  { %377 = vmatprep.mubr.msk.f32.mxu1 %vm34_vm0, %v25_v14 }
  0x14   :  { %366 = vmatmul.mubr.msk.f32.gmra.mxu0 %vm34_vm0, %v18_v15 }
  0x15   :  { %368 = vmatprep.mubr.msk.f32.mxu0 %vm34_vm0, %v19_v16 }
  0x16   :  { %378 = vmatmul.mubr.msk.f32.gmra.mxu1 %vm34_vm0, %v26_v17 }
  0x17   :  { %380 = vmatprep.mubr.msk.f32.mxu1 %vm34_vm0, %v27_v18 }
  0x18   :  { %369 = vmatmul.mubr.msk.f32.gmra.mxu0 %vm34_vm0, %v20_v19 }
  0x1a   :  { %381 = vmatmul.mubr.msk.f32.gmra.mxu1 %vm34_vm0, %v28_v20 }
  0xcc   :  { %v361_v21 = vpop.f32.mrf.mxu0 }
  0xcd   :  { %229 = vst [vmem:[%s548_s2 + $0x8] sm:$0xff] %v361_v21  ;;  %v267_v27 = vmul.f32 %v361_v21, %v361_v21 }
  0xce   :  { %v149_v22 = vpop.f32.mrf.mxu0  ;;  %v373_v23 = vpop.f32.mrf.mxu1 }
  0xcf   :  { %228 = vst [vmem:[%s548_s2] sm:$0xff] %v149_v22  ;;  %v266_v24 = vmul.f32 %v149_v22, %v149_v22  ;;  %237 = vst [vmem:[%s548_s2 + $0x48] sm:$0xff] %v373_v23  ;;  %v244_v28 = vadd.f32 %v361_v21, %v149_v22  ;;  %v275_v61 = vmul.f32 %v373_v23, %v373_v23 }
  0xd0   :  { %v364_v25 = vpop.f32.mrf.mxu0  ;;  %v189_v26 = vpop.f32.mrf.mxu1 }
  0xd1   :  { %231 = vst [vmem:[%s548_s2 + $0x18] sm:$0xff] %v364_v25  ;;  %236 = vst [vmem:[%s548_s2 + $0x40] sm:$0xff] %v189_v26  ;;  %v282_v31 = vadd.f32 %v267_v27, %v266_v24  ;;  %v269_v36 = vmul.f32 %v364_v25, %v364_v25  ;;  %v274_v60 = vmul.f32 %v189_v26, %v189_v26 }
  0xd2   :  { %v159_v29 = vpop.f32.mrf.mxu0  ;;  %v376_v30 = vpop.f32.mrf.mxu1 }
  0xd3   :  { %230 = vst [vmem:[%s548_s2 + $0x10] sm:$0xff] %v159_v29  ;;  %v245_v32 = vadd.f32 %v244_v28, %v159_v29  ;;  %v268_v33 = vmul.f32 %v159_v29, %v159_v29  ;;  %239 = vst [vmem:[%s548_s2 + $0x58] sm:$0xff] %v376_v30  ;;  %v277_v3 = vmul.f32 %v376_v30, %v376_v30 }
  0xd4   :  { %v367_v34 = vpop.f32.mrf.mxu0  ;;  %v199_v35 = vpop.f32.mrf.mxu1 }
  0xd5   :  { %v283_v37 = vadd.f32 %v282_v31, %v268_v33  ;;  %233 = vst [vmem:[%s548_s2 + $0x28] sm:$0xff] %v367_v34  ;;  %v246_v38 = vadd.f32 %v364_v25, %v245_v32  ;;  %238 = vst [vmem:[%s548_s2 + $0x50] sm:$0xff] %v199_v35  ;;  %v271_v46 = vmul.f32 %v367_v34, %v367_v34 }
  0xd6   :  { %v169_v39 = vpop.f32.mrf.mxu0  ;;  %v379_v40 = vpop.f32.mrf.mxu1  ;;  %v276_v1 = vmul.f32 %v199_v35, %v199_v35 }
  0xd7   :  { %232 = vst [vmem:[%s548_s2 + $0x20] sm:$0xff] %v169_v39  ;;  %v247_v41 = vadd.f32 %v246_v38, %v169_v39  ;;  %v270_v42 = vmul.f32 %v169_v39, %v169_v39  ;;  %v284_v43 = vadd.f32 %v283_v37, %v269_v36  ;;  %241 = vst [vmem:[%s548_s2 + $0x68] sm:$0xff] %v379_v40 }
  0xd8   :  { %v370_v44 = vpop.f32.mrf.mxu0  ;;  %v209_v45 = vpop.f32.mrf.mxu1  ;;  %v279_v9 = vmul.f32 %v379_v40, %v379_v40 }
  0xd9   :  { %v285_v47 = vadd.f32 %v284_v43, %v270_v42  ;;  %235 = vst [vmem:[%s548_s2 + $0x38] sm:$0xff] %v370_v44  ;;  %v248_v48 = vadd.f32 %v367_v34, %v247_v41  ;;  %240 = vst [vmem:[%s548_s2 + $0x60] sm:$0xff] %v209_v45  ;;  %v273_v55 = vmul.f32 %v370_v44, %v370_v44 }
  0xda   :  { %v179_v49 = vpop.f32.mrf.mxu0  ;;  %v382_v50 = vpop.f32.mrf.mxu1  ;;  %v278_v7 = vmul.f32 %v209_v45, %v209_v45 }
  0xdb   :  { %234 = vst [vmem:[%s548_s2 + $0x30] sm:$0xff] %v179_v49  ;;  %v249_v51 = vadd.f32 %v248_v48, %v179_v49  ;;  %v272_v52 = vmul.f32 %v179_v49, %v179_v49  ;;  %v286_v53 = vadd.f32 %v285_v47, %v271_v46  ;;  %243 = vst [vmem:[%s548_s2 + $0x78] sm:$0xff] %v382_v50 }
  0xdc   :  { %v219_v54 = vpop.f32.mrf.mxu1  ;;  %v281_v15 = vmul.f32 %v382_v50, %v382_v50 }
  0xdd   :  { %v250_v56 = vadd.f32 %v370_v44, %v249_v51  ;;  %v287_v57 = vadd.f32 %v286_v53, %v272_v52  ;;  %242 = vst [vmem:[%s548_s2 + $0x70] sm:$0xff] %v219_v54  ;;  %v280_v13 = vmul.f32 %v219_v54, %v219_v54 }
  0xdf   :  { %v288_v58 = vadd.f32 %v287_v57, %v273_v55  ;;  %v251_v59 = vadd.f32 %v250_v56, %v189_v26 }
  0xe1   :  { %v289_v62 = vadd.f32 %v288_v58, %v274_v60  ;;  %v252_v63 = vadd.f32 %v373_v23, %v251_v59 }
  0xe3   :  { %v253_v0 = vadd.f32 %v252_v63, %v199_v35  ;;  %v290_v2 = vadd.f32 %v289_v62, %v275_v61 }
  0xe5   :  { %v291_v4 = vadd.f32 %v290_v2, %v276_v1  ;;  %v254_v5 = vadd.f32 %v376_v30, %v253_v0 }
  0xe7   :  { %v255_v6 = vadd.f32 %v254_v5, %v209_v45  ;;  %v292_v8 = vadd.f32 %v291_v4, %v277_v3 }
  0xe9   :  { %v293_v10 = vadd.f32 %v292_v8, %v278_v7  ;;  %v256_v11 = vadd.f32 %v379_v40, %v255_v6 }
  0xeb   :  { %v257_v12 = vadd.f32 %v256_v11, %v219_v54  ;;  %v294_v14 = vadd.f32 %v293_v10, %v279_v9 }
  0xed   :  { %v258_v16 = vadd.f32 %v382_v50, %v257_v12  ;;  %v295_v17 = vadd.f32 %v294_v14, %v280_v13 }
  0xef   :  { %v259_v18 = vrot.slane %v258_v16, 4  ;;  %v296_v19 = vadd.f32 %v295_v17, %v281_v15 }
  0xf1   :  { %v260_v20 = vadd.f32 %v259_v18, %v258_v16  ;;  %v297_v21 = vrot.slane %v296_v19, 4 }
  0xf3   :  { %v261_v22 = vrot.slane %v260_v20, 2  ;;  %v298_v23 = vadd.f32 %v297_v21, %v296_v19 }
  0xf5   :  { %v262_v24 = vadd.f32 %v261_v22, %v260_v20  ;;  %v299_v25 = vrot.slane %v298_v23, 2 }
  0xf7   :  { %v263_v26 = vrot.slane %v262_v24, 1  ;;  %v300_v27 = vadd.f32 %v299_v25, %v298_v23 }
  0xf9   :  { %v264_v28 = vadd.f32 %v263_v26, %v262_v24  ;;  %v301_v29 = vrot.slane %v300_v27, 1 }
  0xfb   :  { %265 = vst [vmem:[%s549_s3] sm:$0x1] %v264_v28  ;;  %v302_v30 = vadd.f32 %v301_v29, %v300_v27 }
  0xfd   :  { %303 = vst [vmem:[%s549_s3 + $0x1] sm:$0x1] %v302_v30 }

</bundles_post_ra>
